<compile_context>
chip_gen: v5e
topology: v5e:2x2
jax: 0.10.0
libtpu: 0.0.40
codegen_flags: <defaults>
</compile_context>

<pallas_src>
import functools

import jax
import jax.numpy as jnp
from jax.experimental import pallas as pl
from jax.experimental.pallas import tpu as pltpu


# ----------------------------------------------------------------------------
# Pallas kernel: one batch tile (Bt elements) per grid step.
# Refs:
#   x_ref   : (Bt, T, F, C)  feature-map block (bf16 or f32), channels-last
#   w_ref   : ((scale-1)*3, width)  depthwise conv taps (prev, curr, next)
#   bns_ref : (1, C)         folded BN scale
#   bnb_ref : (1, C)         folded BN bias
#   fcw_ref : (1, C)         fc weight
#   fcb_ref : (1, 1)         fc bias
#   out_ref : (Bt, 1)        sigmoid(logit) for this batch tile
# ----------------------------------------------------------------------------
def _res2tsm_head_kernel(scale, width, fold,
                         x_ref, w_ref, bns_ref, bnb_ref, fcw_ref, fcb_ref,
                         out_ref):
    Bt, T, F, C = x_ref.shape
    inv_tf = 1.0 / (T * F)
    zero_row = jnp.zeros((1, F, width), jnp.float32)

    # ---- hoist per-group parameter slices out of the batch loop ------------
    bn_s = [bns_ref[0:1, g * width:(g + 1) * width].reshape(1, 1, width)
            for g in range(scale)]
    bn_b = [bnb_ref[0:1, g * width:(g + 1) * width].reshape(1, 1, width)
            for g in range(scale)]
    fc_w = [fcw_ref[0:1, g * width:(g + 1) * width] for g in range(scale)]
    taps = [(w_ref[(i - 1) * 3 + 0:(i - 1) * 3 + 1, :].reshape(1, 1, width),
             w_ref[(i - 1) * 3 + 1:(i - 1) * 3 + 2, :].reshape(1, 1, width),
             w_ref[(i - 1) * 3 + 2:(i - 1) * 3 + 3, :].reshape(1, 1, width))
            for i in range(1, scale)]

    def load_f32(b, t0, t1, c0, c1):
        # upcast right after the (narrow) VMEM load; all math stays f32
        return x_ref[b, t0:t1, :, c0:c1].astype(jnp.float32)

    def shifted_group(b, gi):
        # TemporalShift restricted to Res2 group gi (halo handled in-kernel).
        c0, c1 = gi * width, (gi + 1) * width

        def same():
            return load_f32(b, 0, T, c0, c1)

        def nxt():  # shift forward:  out[t] = x[t+1], out[T-1] = 0
            return jnp.concatenate([load_f32(b, 1, T, c0, c1), zero_row],
                                   axis=0)

        def prv():  # shift backward: out[t] = x[t-1], out[0] = 0
            return jnp.concatenate([zero_row, load_f32(b, 0, T - 1, c0, c1)],
                                   axis=0)

        if c1 <= fold:                           # fully shift-forward group
            return nxt()
        if c0 >= 2 * fold:                       # untouched channels
            return same()
        if c0 >= fold and c1 <= 2 * fold:        # fully shift-backward group
            return prv()
        # group straddles a fold boundary: per-lane select, restricted to the
        # branches that can actually be selected inside this group.
        c_idx = jax.lax.broadcasted_iota(jnp.int32, (T, F, width), 2) + c0
        if c1 <= 2 * fold:                       # only next / prev possible
            return jnp.where(c_idx < fold, nxt(), prv())
        if c0 >= fold:                           # only prev / same possible
            return jnp.where(c_idx < 2 * fold, prv(), same())
        return jnp.where(c_idx < fold, nxt(),    # full three-way
                         jnp.where(c_idx < 2 * fold, prv(), same()))

    def group_contrib(y, gi):
        # fused BN(eval) + ReLU + sum-pool + fc partial sum for one group
        a = jnp.maximum(y * bn_s[gi] + bn_b[gi], 0.0)          # (T, F, width)
        pooled = jnp.sum(a, axis=(0, 1))[None, :]              # (1, width)
        return jnp.sum(pooled * fc_w[gi], axis=1, keepdims=True)   # (1, 1)

    logits = []
    for b in range(Bt):
        # Res2 group 0 passes through untouched
        y = shifted_group(b, 0)
        total = group_contrib(y, 0)

        # Res2 groups 1..scale-1: sp = split_i + y ; y = depthwise temporal conv
        for i in range(1, scale):
            sp = shifted_group(b, i) + y                       # (T, F, width)
            wp, wc, wn = taps[i - 1]
            # (3,1) depthwise temporal conv: interior rows use leading-axis
            # slices of sp; boundary rows computed separately (no full shifted
            # copies of sp are materialized).
            y_first = wc * sp[0:1] + wn * sp[1:2]
            y_mid = wp * sp[0:T - 2] + wc * sp[1:T - 1] + wn * sp[2:T]
            y_last = wp * sp[T - 2:T - 1] + wc * sp[T - 1:T]
            y = jnp.concatenate([y_first, y_mid, y_last], axis=0)
            total = total + group_contrib(y, i)
        logits.append(total)                                   # (1, 1)

    logit = jnp.concatenate(logits, axis=0) * inv_tf + fcb_ref[...]   # (Bt,1)
    out_ref[...] = jax.nn.sigmoid(logit)


# ----------------------------------------------------------------------------
# Wrapper: layout glue (channels-last + bf16 cast, BN folding, batch tiling)
# ----------------------------------------------------------------------------
def res2tsm_head(feat, params, *, scale=4, shift_div=8, eps=1e-5,
                 input_dtype=jnp.bfloat16, max_batch_tile=8):
    B, C, T, F = feat.shape
    assert C % scale == 0 and C % shift_div == 0
    assert T >= 3
    width = C // scale
    fold = C // shift_div

    # channels-last relayout fused with the dtype downcast (single HBM pass);
    # NO temporal padding -- the halo is handled in-kernel with zero rows.
    x = jnp.transpose(feat, (0, 2, 3, 1)).astype(input_dtype)  # (B, T, F, C)

    # Batch tiling: several batch elements per grid step to amortize fixed
    # per-step pipeline overhead, while keeping >= 2 "parallel" grid steps
    # (2-TC split on v7x) whenever B >= 2.
    if B >= 2:
        Bt = min(max_batch_tile, -(-B // 2))
    else:
        Bt = 1  # TODO(synk): B == 1 leaves the second v7x TensorCore idle
    num_tiles = -(-B // Bt)
    B_pad = num_tiles * Bt
    if B_pad != B:
        x = jnp.pad(x, ((0, B_pad - B), (0, 0), (0, 0), (0, 0)))

    # depthwise conv weights (scale-1, width, 3) -> ((scale-1)*3, width)
    # row (i-1)*3 + k is tap k (0=prev, 1=curr, 2=next) of group i's conv
    w2 = jnp.transpose(params["conv_w"], (0, 2, 1)).reshape(
        (scale - 1) * 3, width).astype(jnp.float32)

    # fold BatchNorm (eval mode) into per-channel scale / shift
    s = params["bn_gamma"] / jnp.sqrt(params["bn_var"] + eps)
    b = params["bn_beta"] - params["bn_mean"] * s
    bns = s[None, :].astype(jnp.float32)                        # (1, C)
    bnb = b[None, :].astype(jnp.float32)                        # (1, C)
    fcw = params["fc_w"].reshape(1, C).astype(jnp.float32)
    fcb = params["fc_b"].reshape(1, 1).astype(jnp.float32)

    kernel = functools.partial(_res2tsm_head_kernel, scale, width, fold)

    itemsize = jnp.dtype(input_dtype).itemsize
    bytes_accessed = (B_pad * T * F * C * itemsize
                      + ((scale - 1) * 3 * width + 4 * C + 1) * 4
                      + B_pad * 4)
    cost = pl.CostEstimate(flops=B_pad * T * F * C * 10,
                           transcendentals=B_pad * 4,
                           bytes_accessed=bytes_accessed)

    out = pl.pallas_call(
        kernel,
        out_shape=jax.ShapeDtypeStruct((num_tiles, Bt, 1), jnp.float32),
        grid=(num_tiles,),
        in_specs=[
            pl.BlockSpec((Bt, T, F, C), lambda bb: (bb, 0, 0, 0)),
            pl.BlockSpec(((scale - 1) * 3, width), lambda bb: (0, 0)),
            pl.BlockSpec((1, C), lambda bb: (0, 0)),
            pl.BlockSpec((1, C), lambda bb: (0, 0)),
            pl.BlockSpec((1, C), lambda bb: (0, 0)),
            pl.BlockSpec((1, 1), lambda bb: (0, 0)),
        ],
        out_specs=pl.BlockSpec((None, Bt, 1), lambda bb: (bb, 0, 0)),
        compiler_params=pltpu.CompilerParams(
            dimension_semantics=("parallel",)),
        cost_estimate=cost,
    )(x, w2, bns, bnb, fcw, fcb)
    return out.reshape(B_pad)[:B]


# ----------------------------------------------------------------------------
# Pure-JAX reference (mirrors the PyTorch forward, eval mode)
# ----------------------------------------------------------------------------
def reference(feat, params, *, scale=4, shift_div=8, eps=1e-5):
    B, C, T, F = feat.shape
    fold = C // shift_div
    width = C // scale

    x_next = jnp.concatenate(
        [feat[:, :, 1:], jnp.zeros_like(feat[:, :, :1])], axis=2)
    x_prev = jnp.concatenate(
        [jnp.zeros_like(feat[:, :, :1]), feat[:, :, :-1]], axis=2)
    shifted = jnp.concatenate(
        [x_next[:, :fold], x_prev[:, fold:2 * fold], feat[:, 2 * fold:]], axis=1)

    y = shifted[:, :width]
    outs = [y]
    for i in range(1, scale):
        sp = shifted[:, i * width:(i + 1) * width] + y
        sp_pad = jnp.pad(sp, ((0, 0), (0, 0), (1, 1), (0, 0)))
        w = params["conv_w"][i - 1]  # (width, 3)
        y = (w[:, 0][None, :, None, None] * sp_pad[:, :, 0:T]
             + w[:, 1][None, :, None, None] * sp_pad[:, :, 1:T + 1]
             + w[:, 2][None, :, None, None] * sp_pad[:, :, 2:T + 2])
        outs.append(y)
    out = jnp.concatenate(outs, axis=1)

    s = params["bn_gamma"] / jnp.sqrt(params["bn_var"] + eps)
    b = params["bn_beta"] - params["bn_mean"] * s
    out = jnp.maximum(out * s[None, :, None, None] + b[None, :, None, None], 0.0)

    pooled = out.mean(axis=(2, 3))                      # (B, C)
    logit = pooled @ params["fc_w"][0] + params["fc_b"][0]
    return jax.nn.sigmoid(logit)


def init_params(key, C, scale):
    width = C // scale
    ks = jax.random.split(key, 6)
    return {
        "conv_w": 0.1 * jax.random.normal(ks[0], (scale - 1, width, 3), jnp.float32),
        "bn_gamma": 1.0 + 0.1 * jax.random.normal(ks[1], (C,), jnp.float32),
        "bn_beta": 0.1 * jax.random.normal(ks[2], (C,), jnp.float32),
        "bn_mean": 0.1 * jax.random.normal(ks[3], (C,), jnp.float32),
        "bn_var": jnp.abs(1.0 + 0.1 * jax.random.normal(ks[4], (C,), jnp.float32)),
        "fc_w": 0.1 * jax.random.normal(ks[5], (1, C), jnp.float32),
        "fc_b": jnp.full((1,), 0.05, jnp.float32),
    }


def _check(feat, params, scale, shift_div):
    out = res2tsm_head(feat, params, scale=scale, shift_div=shift_div)
    out = jax.block_until_ready(out)
    assert out.shape == (feat.shape[0],)

    # strict check: reference evaluated on the bf16-rounded feature map (the
    # kernel streams the input as bf16 but computes everything in f32)
    feat_q = feat.astype(jnp.bfloat16).astype(jnp.float32)
    ref_q = reference(feat_q, params, scale=scale, shift_div=shift_div)
    assert jnp.allclose(out, ref_q, atol=1e-4, rtol=1e-4), (out, ref_q)

    # loose check against the full-f32 reference (only bf16 input quantization
    # separates the two)
    ref = reference(feat, params, scale=scale, shift_div=shift_div)
    assert jnp.allclose(out, ref, atol=2e-2), (out, ref)


if __name__ == "__main__":
    # backbone feature map (small synthetic shape; C chosen so each Res2 group
    # is a full 128-lane tile, as in a real 960/1280-channel MobileNetV4 head)
    C, T, F = 512, 8, 8
    SCALE, SHIFT_DIV = 4, 8

    key = jax.random.PRNGKey(0)
    k_feat, k_feat2, k_params = jax.random.split(key, 3)
    params = init_params(k_params, C, SCALE)

    # B=2: two single-element grid steps (2-TC parallel split)
    feat = jax.random.normal(k_feat, (2, C, T, F), jnp.float32)
    _check(feat, params, SCALE, SHIFT_DIV)

    # B=5: exercises multi-element batch tiles (Bt=3) + batch padding
    feat2 = jax.random.normal(k_feat2, (5, C, T, F), jnp.float32)
    _check(feat2, params, SCALE, SHIFT_DIV)

    print("KERNEL_OK")
</pallas_src>

<mosaic_0001>
module attributes {stable_mosaic.version = 11 : i64} {
  func.func @_res2tsm_head_kernel(%arg0: i32, %arg1: memref<1x8x8x512xbf16, #tpu.memory_space<vmem>>, %arg2: memref<9x128xf32, #tpu.memory_space<vmem>>, %arg3: memref<1x512xf32, #tpu.memory_space<vmem>>, %arg4: memref<1x512xf32, #tpu.memory_space<vmem>>, %arg5: memref<1x512xf32, #tpu.memory_space<vmem>>, %arg6: memref<1x1xf32, #tpu.memory_space<vmem>>, %arg7: memref<1x1x1xf32, #tpu.memory_space<vmem>>) attributes {dimension_semantics = [#tpu.dimension_semantics<parallel>], iteration_bounds = array<i64: 2>, scalar_prefetch = 0 : i64, scratch_operands = 0 : i64, tpu.core_type = #tpu.core_type<tc>, window_params = [{transform_indices = @transform_0, window_bounds = array<i64: 1, 8, 8, 512>}, {pipeline_mode = #tpu.pipeline_mode<synchronous>, transform_indices = @transform_1, window_bounds = array<i64: 9, 128>}, {pipeline_mode = #tpu.pipeline_mode<synchronous>, transform_indices = @transform_2, window_bounds = array<i64: 1, 512>}, {pipeline_mode = #tpu.pipeline_mode<synchronous>, transform_indices = @transform_3, window_bounds = array<i64: 1, 512>}, {pipeline_mode = #tpu.pipeline_mode<synchronous>, transform_indices = @transform_4, window_bounds = array<i64: 1, 512>}, {pipeline_mode = #tpu.pipeline_mode<synchronous>, transform_indices = @transform_5, window_bounds = array<i64: 1, 1>}, {transform_indices = @transform_6, window_bounds = array<i64: 1, 1, 1>}]} {
    %cst = arith.constant 0.000000e+00 : f32
    %0 = vector.broadcast %cst : f32 to vector<1x8x128xf32>
    %c0 = arith.constant 0 : index
    %c0_0 = arith.constant 0 : index
    %1 = vector.load %arg3[%c0, %c0_0] : memref<1x512xf32, #tpu.memory_space<vmem>>, vector<1x128xf32>
    %2 = vector.shape_cast %1 : vector<1x128xf32> to vector<1x1x128xf32>
    %c0_1 = arith.constant 0 : index
    %c128 = arith.constant 128 : index
    %3 = vector.load %arg3[%c0_1, %c128] : memref<1x512xf32, #tpu.memory_space<vmem>>, vector<1x128xf32>
    %4 = vector.shape_cast %3 : vector<1x128xf32> to vector<1x1x128xf32>
    %c0_2 = arith.constant 0 : index
    %c256 = arith.constant 256 : index
    %5 = vector.load %arg3[%c0_2, %c256] : memref<1x512xf32, #tpu.memory_space<vmem>>, vector<1x128xf32>
    %6 = vector.shape_cast %5 : vector<1x128xf32> to vector<1x1x128xf32>
    %c0_3 = arith.constant 0 : index
    %c384 = arith.constant 384 : index
    %7 = vector.load %arg3[%c0_3, %c384] : memref<1x512xf32, #tpu.memory_space<vmem>>, vector<1x128xf32>
    %8 = vector.shape_cast %7 : vector<1x128xf32> to vector<1x1x128xf32>
    %c0_4 = arith.constant 0 : index
    %c0_5 = arith.constant 0 : index
    %9 = vector.load %arg4[%c0_4, %c0_5] : memref<1x512xf32, #tpu.memory_space<vmem>>, vector<1x128xf32>
    %10 = vector.shape_cast %9 : vector<1x128xf32> to vector<1x1x128xf32>
    %c0_6 = arith.constant 0 : index
    %c128_7 = arith.constant 128 : index
    %11 = vector.load %arg4[%c0_6, %c128_7] : memref<1x512xf32, #tpu.memory_space<vmem>>, vector<1x128xf32>
    %12 = vector.shape_cast %11 : vector<1x128xf32> to vector<1x1x128xf32>
    %c0_8 = arith.constant 0 : index
    %c256_9 = arith.constant 256 : index
    %13 = vector.load %arg4[%c0_8, %c256_9] : memref<1x512xf32, #tpu.memory_space<vmem>>, vector<1x128xf32>
    %14 = vector.shape_cast %13 : vector<1x128xf32> to vector<1x1x128xf32>
    %c0_10 = arith.constant 0 : index
    %c384_11 = arith.constant 384 : index
    %15 = vector.load %arg4[%c0_10, %c384_11] : memref<1x512xf32, #tpu.memory_space<vmem>>, vector<1x128xf32>
    %16 = vector.shape_cast %15 : vector<1x128xf32> to vector<1x1x128xf32>
    %c0_12 = arith.constant 0 : index
    %c0_13 = arith.constant 0 : index
    %17 = vector.load %arg5[%c0_12, %c0_13] : memref<1x512xf32, #tpu.memory_space<vmem>>, vector<1x128xf32>
    %c0_14 = arith.constant 0 : index
    %c128_15 = arith.constant 128 : index
    %18 = vector.load %arg5[%c0_14, %c128_15] : memref<1x512xf32, #tpu.memory_space<vmem>>, vector<1x128xf32>
    %c0_16 = arith.constant 0 : index
    %c256_17 = arith.constant 256 : index
    %19 = vector.load %arg5[%c0_16, %c256_17] : memref<1x512xf32, #tpu.memory_space<vmem>>, vector<1x128xf32>
    %c0_18 = arith.constant 0 : index
    %c384_19 = arith.constant 384 : index
    %20 = vector.load %arg5[%c0_18, %c384_19] : memref<1x512xf32, #tpu.memory_space<vmem>>, vector<1x128xf32>
    %c0_20 = arith.constant 0 : index
    %c0_21 = arith.constant 0 : index
    %21 = vector.load %arg2[%c0_20, %c0_21] : memref<9x128xf32, #tpu.memory_space<vmem>>, vector<1x128xf32>
    %22 = vector.shape_cast %21 : vector<1x128xf32> to vector<1x1x128xf32>
    %c1 = arith.constant 1 : index
    %c0_22 = arith.constant 0 : index
    %23 = vector.load %arg2[%c1, %c0_22] : memref<9x128xf32, #tpu.memory_space<vmem>>, vector<1x128xf32>
    %24 = vector.shape_cast %23 : vector<1x128xf32> to vector<1x1x128xf32>
    %c2 = arith.constant 2 : index
    %c0_23 = arith.constant 0 : index
    %25 = vector.load %arg2[%c2, %c0_23] : memref<9x128xf32, #tpu.memory_space<vmem>>, vector<1x128xf32>
    %26 = vector.shape_cast %25 : vector<1x128xf32> to vector<1x1x128xf32>
    %c3 = arith.constant 3 : index
    %c0_24 = arith.constant 0 : index
    %27 = vector.load %arg2[%c3, %c0_24] : memref<9x128xf32, #tpu.memory_space<vmem>>, vector<1x128xf32>
    %28 = vector.shape_cast %27 : vector<1x128xf32> to vector<1x1x128xf32>
    %c4 = arith.constant 4 : index
    %c0_25 = arith.constant 0 : index
    %29 = vector.load %arg2[%c4, %c0_25] : memref<9x128xf32, #tpu.memory_space<vmem>>, vector<1x128xf32>
    %30 = vector.shape_cast %29 : vector<1x128xf32> to vector<1x1x128xf32>
    %c5 = arith.constant 5 : index
    %c0_26 = arith.constant 0 : index
    %31 = vector.load %arg2[%c5, %c0_26] : memref<9x128xf32, #tpu.memory_space<vmem>>, vector<1x128xf32>
    %32 = vector.shape_cast %31 : vector<1x128xf32> to vector<1x1x128xf32>
    %c6 = arith.constant 6 : index
    %c0_27 = arith.constant 0 : index
    %33 = vector.load %arg2[%c6, %c0_27] : memref<9x128xf32, #tpu.memory_space<vmem>>, vector<1x128xf32>
    %34 = vector.shape_cast %33 : vector<1x128xf32> to vector<1x1x128xf32>
    %c7 = arith.constant 7 : index
    %c0_28 = arith.constant 0 : index
    %35 = vector.load %arg2[%c7, %c0_28] : memref<9x128xf32, #tpu.memory_space<vmem>>, vector<1x128xf32>
    %36 = vector.shape_cast %35 : vector<1x128xf32> to vector<1x1x128xf32>
    %c8 = arith.constant 8 : index
    %c0_29 = arith.constant 0 : index
    %37 = vector.load %arg2[%c8, %c0_29] : memref<9x128xf32, #tpu.memory_space<vmem>>, vector<1x128xf32>
    %38 = vector.shape_cast %37 : vector<1x128xf32> to vector<1x1x128xf32>
    %39 = tpu.iota {dimensions = array<i32: 2>} : vector<8x8x128xi32>
    %c0_i32 = arith.constant 0 : i32
    %40 = vector.broadcast %c0_i32 : i32 to vector<8x8x128xi32>
    %41 = arith.addi %39, %40 : vector<8x8x128xi32>
    %c64_i32 = arith.constant 64 : i32
    %42 = vector.broadcast %c64_i32 : i32 to vector<8x8x128xi32>
    %43 = arith.cmpi slt, %41, %42 : vector<8x8x128xi32>
    %c0_30 = arith.constant 0 : index
    %c1_31 = arith.constant 1 : index
    %c0_32 = arith.constant 0 : index
    %c0_33 = arith.constant 0 : index
    %44 = vector.load %arg1[%c0_30, %c1_31, %c0_32, %c0_33] : memref<1x8x8x512xbf16, #tpu.memory_space<vmem>>, vector<1x7x8x128xbf16>
    %45 = vector.shape_cast %44 : vector<1x7x8x128xbf16> to vector<7x8x128xbf16>
    %46 = arith.extf %45 : vector<7x8x128xbf16> to vector<7x8x128xf32>
    %47 = tpu.concatenate %46, %0 in 0 : vector<7x8x128xf32>, vector<1x8x128xf32> -> vector<8x8x128xf32>
    %c0_34 = arith.constant 0 : index
    %c0_35 = arith.constant 0 : index
    %c0_36 = arith.constant 0 : index
    %c0_37 = arith.constant 0 : index
    %48 = vector.load %arg1[%c0_34, %c0_35, %c0_36, %c0_37] : memref<1x8x8x512xbf16, #tpu.memory_space<vmem>>, vector<1x7x8x128xbf16>
    %49 = vector.shape_cast %48 : vector<1x7x8x128xbf16> to vector<7x8x128xbf16>
    %50 = arith.extf %49 : vector<7x8x128xbf16> to vector<7x8x128xf32>
    %51 = tpu.concatenate %0, %50 in 0 : vector<1x8x128xf32>, vector<7x8x128xf32> -> vector<8x8x128xf32>
    %52 = arith.select %43, %47, %51 : vector<8x8x128xi1>, vector<8x8x128xf32>
    %53 = vector.broadcast %2 : vector<1x1x128xf32> to vector<8x8x128xf32>
    %54 = arith.mulf %52, %53 : vector<8x8x128xf32>
    %55 = vector.broadcast %10 : vector<1x1x128xf32> to vector<8x8x128xf32>
    %56 = arith.addf %54, %55 : vector<8x8x128xf32>
    %cst_38 = arith.constant 0.000000e+00 : f32
    %57 = vector.broadcast %cst_38 : f32 to vector<8x8x128xf32>
    %58 = arith.maximumf %56, %57 : vector<8x8x128xf32>
    %cst_39 = arith.constant dense<0.000000e+00> : vector<128xf32>
    %59 = vector.multi_reduction <add>, %58, %cst_39 [0, 1] : vector<8x8x128xf32> to vector<128xf32>
    %60 = vector.shape_cast %59 : vector<128xf32> to vector<1x128xf32>
    %61 = arith.mulf %60, %17 : vector<1x128xf32>
    %cst_40 = arith.constant dense<0.000000e+00> : vector<1xf32>
    %62 = vector.multi_reduction <add>, %61, %cst_40 [1] : vector<1x128xf32> to vector<1xf32>
    %63 = vector.shape_cast %62 : vector<1xf32> to vector<1x1xf32>
    %c0_41 = arith.constant 0 : index
    %c0_42 = arith.constant 0 : index
    %c0_43 = arith.constant 0 : index
    %c128_44 = arith.constant 128 : index
    %64 = vector.load %arg1[%c0_41, %c0_42, %c0_43, %c128_44] : memref<1x8x8x512xbf16, #tpu.memory_space<vmem>>, vector<1x8x8x128xbf16>
    %65 = vector.shape_cast %64 : vector<1x8x8x128xbf16> to vector<8x8x128xbf16>
    %66 = arith.extf %65 : vector<8x8x128xbf16> to vector<8x8x128xf32>
    %67 = arith.addf %66, %52 : vector<8x8x128xf32>
    %68 = vector.extract_strided_slice %67 {offsets = [0, 0, 0], sizes = [1, 8, 128], strides = [1, 1, 1]} : vector<8x8x128xf32> to vector<1x8x128xf32>
    %69 = vector.broadcast %24 : vector<1x1x128xf32> to vector<1x8x128xf32>
    %70 = arith.mulf %69, %68 : vector<1x8x128xf32>
    %71 = vector.extract_strided_slice %67 {offsets = [1, 0, 0], sizes = [1, 8, 128], strides = [1, 1, 1]} : vector<8x8x128xf32> to vector<1x8x128xf32>
    %72 = vector.broadcast %26 : vector<1x1x128xf32> to vector<1x8x128xf32>
    %73 = arith.mulf %72, %71 : vector<1x8x128xf32>
    %74 = arith.addf %70, %73 : vector<1x8x128xf32>
    %75 = vector.extract_strided_slice %67 {offsets = [0, 0, 0], sizes = [6, 8, 128], strides = [1, 1, 1]} : vector<8x8x128xf32> to vector<6x8x128xf32>
    %76 = vector.broadcast %22 : vector<1x1x128xf32> to vector<6x8x128xf32>
    %77 = arith.mulf %76, %75 : vector<6x8x128xf32>
    %78 = vector.extract_strided_slice %67 {offsets = [1, 0, 0], sizes = [6, 8, 128], strides = [1, 1, 1]} : vector<8x8x128xf32> to vector<6x8x128xf32>
    %79 = vector.broadcast %24 : vector<1x1x128xf32> to vector<6x8x128xf32>
    %80 = arith.mulf %79, %78 : vector<6x8x128xf32>
    %81 = arith.addf %77, %80 : vector<6x8x128xf32>
    %82 = vector.extract_strided_slice %67 {offsets = [2, 0, 0], sizes = [6, 8, 128], strides = [1, 1, 1]} : vector<8x8x128xf32> to vector<6x8x128xf32>
    %83 = vector.broadcast %26 : vector<1x1x128xf32> to vector<6x8x128xf32>
    %84 = arith.mulf %83, %82 : vector<6x8x128xf32>
    %85 = arith.addf %81, %84 : vector<6x8x128xf32>
    %86 = vector.extract_strided_slice %67 {offsets = [6, 0, 0], sizes = [1, 8, 128], strides = [1, 1, 1]} : vector<8x8x128xf32> to vector<1x8x128xf32>
    %87 = vector.broadcast %22 : vector<1x1x128xf32> to vector<1x8x128xf32>
    %88 = arith.mulf %87, %86 : vector<1x8x128xf32>
    %89 = vector.extract_strided_slice %67 {offsets = [7, 0, 0], sizes = [1, 8, 128], strides = [1, 1, 1]} : vector<8x8x128xf32> to vector<1x8x128xf32>
    %90 = vector.broadcast %24 : vector<1x1x128xf32> to vector<1x8x128xf32>
    %91 = arith.mulf %90, %89 : vector<1x8x128xf32>
    %92 = arith.addf %88, %91 : vector<1x8x128xf32>
    %93 = tpu.concatenate %74, %85, %92 in 0 : vector<1x8x128xf32>, vector<6x8x128xf32>, vector<1x8x128xf32> -> vector<8x8x128xf32>
    %94 = vector.broadcast %4 : vector<1x1x128xf32> to vector<8x8x128xf32>
    %95 = arith.mulf %93, %94 : vector<8x8x128xf32>
    %96 = vector.broadcast %12 : vector<1x1x128xf32> to vector<8x8x128xf32>
    %97 = arith.addf %95, %96 : vector<8x8x128xf32>
    %cst_45 = arith.constant 0.000000e+00 : f32
    %98 = vector.broadcast %cst_45 : f32 to vector<8x8x128xf32>
    %99 = arith.maximumf %97, %98 : vector<8x8x128xf32>
    %cst_46 = arith.constant dense<0.000000e+00> : vector<128xf32>
    %100 = vector.multi_reduction <add>, %99, %cst_46 [0, 1] : vector<8x8x128xf32> to vector<128xf32>
    %101 = vector.shape_cast %100 : vector<128xf32> to vector<1x128xf32>
    %102 = arith.mulf %101, %18 : vector<1x128xf32>
    %cst_47 = arith.constant dense<0.000000e+00> : vector<1xf32>
    %103 = vector.multi_reduction <add>, %102, %cst_47 [1] : vector<1x128xf32> to vector<1xf32>
    %104 = vector.shape_cast %103 : vector<1xf32> to vector<1x1xf32>
    %105 = arith.addf %63, %104 : vector<1x1xf32>
    %c0_48 = arith.constant 0 : index
    %c0_49 = arith.constant 0 : index
    %c0_50 = arith.constant 0 : index
    %c256_51 = arith.constant 256 : index
    %106 = vector.load %arg1[%c0_48, %c0_49, %c0_50, %c256_51] : memref<1x8x8x512xbf16, #tpu.memory_space<vmem>>, vector<1x8x8x128xbf16>
    %107 = vector.shape_cast %106 : vector<1x8x8x128xbf16> to vector<8x8x128xbf16>
    %108 = arith.extf %107 : vector<8x8x128xbf16> to vector<8x8x128xf32>
    %109 = arith.addf %108, %93 : vector<8x8x128xf32>
    %110 = vector.extract_strided_slice %109 {offsets = [0, 0, 0], sizes = [1, 8, 128], strides = [1, 1, 1]} : vector<8x8x128xf32> to vector<1x8x128xf32>
    %111 = vector.broadcast %30 : vector<1x1x128xf32> to vector<1x8x128xf32>
    %112 = arith.mulf %111, %110 : vector<1x8x128xf32>
    %113 = vector.extract_strided_slice %109 {offsets = [1, 0, 0], sizes = [1, 8, 128], strides = [1, 1, 1]} : vector<8x8x128xf32> to vector<1x8x128xf32>
    %114 = vector.broadcast %32 : vector<1x1x128xf32> to vector<1x8x128xf32>
    %115 = arith.mulf %114, %113 : vector<1x8x128xf32>
    %116 = arith.addf %112, %115 : vector<1x8x128xf32>
    %117 = vector.extract_strided_slice %109 {offsets = [0, 0, 0], sizes = [6, 8, 128], strides = [1, 1, 1]} : vector<8x8x128xf32> to vector<6x8x128xf32>
    %118 = vector.broadcast %28 : vector<1x1x128xf32> to vector<6x8x128xf32>
    %119 = arith.mulf %118, %117 : vector<6x8x128xf32>
    %120 = vector.extract_strided_slice %109 {offsets = [1, 0, 0], sizes = [6, 8, 128], strides = [1, 1, 1]} : vector<8x8x128xf32> to vector<6x8x128xf32>
    %121 = vector.broadcast %30 : vector<1x1x128xf32> to vector<6x8x128xf32>
    %122 = arith.mulf %121, %120 : vector<6x8x128xf32>
    %123 = arith.addf %119, %122 : vector<6x8x128xf32>
    %124 = vector.extract_strided_slice %109 {offsets = [2, 0, 0], sizes = [6, 8, 128], strides = [1, 1, 1]} : vector<8x8x128xf32> to vector<6x8x128xf32>
    %125 = vector.broadcast %32 : vector<1x1x128xf32> to vector<6x8x128xf32>
    %126 = arith.mulf %125, %124 : vector<6x8x128xf32>
    %127 = arith.addf %123, %126 : vector<6x8x128xf32>
    %128 = vector.extract_strided_slice %109 {offsets = [6, 0, 0], sizes = [1, 8, 128], strides = [1, 1, 1]} : vector<8x8x128xf32> to vector<1x8x128xf32>
    %129 = vector.broadcast %28 : vector<1x1x128xf32> to vector<1x8x128xf32>
    %130 = arith.mulf %129, %128 : vector<1x8x128xf32>
    %131 = vector.extract_strided_slice %109 {offsets = [7, 0, 0], sizes = [1, 8, 128], strides = [1, 1, 1]} : vector<8x8x128xf32> to vector<1x8x128xf32>
    %132 = vector.broadcast %30 : vector<1x1x128xf32> to vector<1x8x128xf32>
    %133 = arith.mulf %132, %131 : vector<1x8x128xf32>
    %134 = arith.addf %130, %133 : vector<1x8x128xf32>
    %135 = tpu.concatenate %116, %127, %134 in 0 : vector<1x8x128xf32>, vector<6x8x128xf32>, vector<1x8x128xf32> -> vector<8x8x128xf32>
    %136 = vector.broadcast %6 : vector<1x1x128xf32> to vector<8x8x128xf32>
    %137 = arith.mulf %135, %136 : vector<8x8x128xf32>
    %138 = vector.broadcast %14 : vector<1x1x128xf32> to vector<8x8x128xf32>
    %139 = arith.addf %137, %138 : vector<8x8x128xf32>
    %cst_52 = arith.constant 0.000000e+00 : f32
    %140 = vector.broadcast %cst_52 : f32 to vector<8x8x128xf32>
    %141 = arith.maximumf %139, %140 : vector<8x8x128xf32>
    %cst_53 = arith.constant dense<0.000000e+00> : vector<128xf32>
    %142 = vector.multi_reduction <add>, %141, %cst_53 [0, 1] : vector<8x8x128xf32> to vector<128xf32>
    %143 = vector.shape_cast %142 : vector<128xf32> to vector<1x128xf32>
    %144 = arith.mulf %143, %19 : vector<1x128xf32>
    %cst_54 = arith.constant dense<0.000000e+00> : vector<1xf32>
    %145 = vector.multi_reduction <add>, %144, %cst_54 [1] : vector<1x128xf32> to vector<1xf32>
    %146 = vector.shape_cast %145 : vector<1xf32> to vector<1x1xf32>
    %147 = arith.addf %105, %146 : vector<1x1xf32>
    %c0_55 = arith.constant 0 : index
    %c0_56 = arith.constant 0 : index
    %c0_57 = arith.constant 0 : index
    %c384_58 = arith.constant 384 : index
    %148 = vector.load %arg1[%c0_55, %c0_56, %c0_57, %c384_58] : memref<1x8x8x512xbf16, #tpu.memory_space<vmem>>, vector<1x8x8x128xbf16>
    %149 = vector.shape_cast %148 : vector<1x8x8x128xbf16> to vector<8x8x128xbf16>
    %150 = arith.extf %149 : vector<8x8x128xbf16> to vector<8x8x128xf32>
    %151 = arith.addf %150, %135 : vector<8x8x128xf32>
    %152 = vector.extract_strided_slice %151 {offsets = [0, 0, 0], sizes = [1, 8, 128], strides = [1, 1, 1]} : vector<8x8x128xf32> to vector<1x8x128xf32>
    %153 = vector.broadcast %36 : vector<1x1x128xf32> to vector<1x8x128xf32>
    %154 = arith.mulf %153, %152 : vector<1x8x128xf32>
    %155 = vector.extract_strided_slice %151 {offsets = [1, 0, 0], sizes = [1, 8, 128], strides = [1, 1, 1]} : vector<8x8x128xf32> to vector<1x8x128xf32>
    %156 = vector.broadcast %38 : vector<1x1x128xf32> to vector<1x8x128xf32>
    %157 = arith.mulf %156, %155 : vector<1x8x128xf32>
    %158 = arith.addf %154, %157 : vector<1x8x128xf32>
    %159 = vector.extract_strided_slice %151 {offsets = [0, 0, 0], sizes = [6, 8, 128], strides = [1, 1, 1]} : vector<8x8x128xf32> to vector<6x8x128xf32>
    %160 = vector.broadcast %34 : vector<1x1x128xf32> to vector<6x8x128xf32>
    %161 = arith.mulf %160, %159 : vector<6x8x128xf32>
    %162 = vector.extract_strided_slice %151 {offsets = [1, 0, 0], sizes = [6, 8, 128], strides = [1, 1, 1]} : vector<8x8x128xf32> to vector<6x8x128xf32>
    %163 = vector.broadcast %36 : vector<1x1x128xf32> to vector<6x8x128xf32>
    %164 = arith.mulf %163, %162 : vector<6x8x128xf32>
    %165 = arith.addf %161, %164 : vector<6x8x128xf32>
    %166 = vector.extract_strided_slice %151 {offsets = [2, 0, 0], sizes = [6, 8, 128], strides = [1, 1, 1]} : vector<8x8x128xf32> to vector<6x8x128xf32>
    %167 = vector.broadcast %38 : vector<1x1x128xf32> to vector<6x8x128xf32>
    %168 = arith.mulf %167, %166 : vector<6x8x128xf32>
    %169 = arith.addf %165, %168 : vector<6x8x128xf32>
    %170 = vector.extract_strided_slice %151 {offsets = [6, 0, 0], sizes = [1, 8, 128], strides = [1, 1, 1]} : vector<8x8x128xf32> to vector<1x8x128xf32>
    %171 = vector.broadcast %34 : vector<1x1x128xf32> to vector<1x8x128xf32>
    %172 = arith.mulf %171, %170 : vector<1x8x128xf32>
    %173 = vector.extract_strided_slice %151 {offsets = [7, 0, 0], sizes = [1, 8, 128], strides = [1, 1, 1]} : vector<8x8x128xf32> to vector<1x8x128xf32>
    %174 = vector.broadcast %36 : vector<1x1x128xf32> to vector<1x8x128xf32>
    %175 = arith.mulf %174, %173 : vector<1x8x128xf32>
    %176 = arith.addf %172, %175 : vector<1x8x128xf32>
    %177 = tpu.concatenate %158, %169, %176 in 0 : vector<1x8x128xf32>, vector<6x8x128xf32>, vector<1x8x128xf32> -> vector<8x8x128xf32>
    %178 = vector.broadcast %8 : vector<1x1x128xf32> to vector<8x8x128xf32>
    %179 = arith.mulf %177, %178 : vector<8x8x128xf32>
    %180 = vector.broadcast %16 : vector<1x1x128xf32> to vector<8x8x128xf32>
    %181 = arith.addf %179, %180 : vector<8x8x128xf32>
    %cst_59 = arith.constant 0.000000e+00 : f32
    %182 = vector.broadcast %cst_59 : f32 to vector<8x8x128xf32>
    %183 = arith.maximumf %181, %182 : vector<8x8x128xf32>
    %cst_60 = arith.constant dense<0.000000e+00> : vector<128xf32>
    %184 = vector.multi_reduction <add>, %183, %cst_60 [0, 1] : vector<8x8x128xf32> to vector<128xf32>
    %185 = vector.shape_cast %184 : vector<128xf32> to vector<1x128xf32>
    %186 = arith.mulf %185, %20 : vector<1x128xf32>
    %cst_61 = arith.constant dense<0.000000e+00> : vector<1xf32>
    %187 = vector.multi_reduction <add>, %186, %cst_61 [1] : vector<1x128xf32> to vector<1xf32>
    %188 = vector.shape_cast %187 : vector<1xf32> to vector<1x1xf32>
    %189 = arith.addf %147, %188 : vector<1x1xf32>
    %cst_62 = arith.constant 1.562500e-02 : f32
    %190 = vector.broadcast %cst_62 : f32 to vector<1x1xf32>
    %191 = arith.mulf %189, %190 : vector<1x1xf32>
    %c0_63 = arith.constant 0 : index
    %c0_64 = arith.constant 0 : index
    %192 = vector.load %arg6[%c0_63, %c0_64] : memref<1x1xf32, #tpu.memory_space<vmem>>, vector<1x1xf32>
    %193 = arith.addf %191, %192 : vector<1x1xf32>
    %194 = arith.negf %193 : vector<1x1xf32>
    %195 = math.exp %194 : vector<1x1xf32>
    %cst_65 = arith.constant 1.000000e+00 : f32
    %196 = vector.broadcast %cst_65 : f32 to vector<1x1xf32>
    %197 = arith.addf %196, %195 : vector<1x1xf32>
    %198 = arith.divf %196, %197 : vector<1x1xf32>
    %c0_66 = arith.constant 0 : index
    %c0_67 = arith.constant 0 : index
    %c0_68 = arith.constant 0 : index
    %199 = vector.load %arg7[%c0_66, %c0_67, %c0_68] : memref<1x1x1xf32, #tpu.memory_space<vmem>>, vector<1x1x1xf32>
    %200 = vector.shape_cast %199 : vector<1x1x1xf32> to vector<1x1xf32>
    %201 = vector.shape_cast %198 : vector<1x1xf32> to vector<1x1x1xf32>
    tpu.vector_store %arg7[%c0_66, %c0_67, %c0_68], %201 {strides = array<i32>} : memref<1x1x1xf32, #tpu.memory_space<vmem>>, vector<1x1x1xf32>,
    return
  }
  func.func @transform_0(%arg0: i32) -> (i32, i32, i32, i32) {
    %c0_i32 = arith.constant 0 : i32
    %c0_i32_0 = arith.constant 0 : i32
    %c0_i32_1 = arith.constant 0 : i32
    %c0_i32_2 = arith.constant 0 : i32
    return %arg0, %c0_i32, %c0_i32_0, %c0_i32_1 : i32, i32, i32, i32
  }
  func.func @transform_1(%arg0: i32) -> (i32, i32) {
    %c0_i32 = arith.constant 0 : i32
    %c0_i32_0 = arith.constant 0 : i32
    %c0_i32_1 = arith.constant 0 : i32
    return %c0_i32, %c0_i32_0 : i32, i32
  }
  func.func @transform_2(%arg0: i32) -> (i32, i32) {
    %c0_i32 = arith.constant 0 : i32
    %c0_i32_0 = arith.constant 0 : i32
    %c0_i32_1 = arith.constant 0 : i32
    return %c0_i32, %c0_i32_0 : i32, i32
  }
  func.func @transform_3(%arg0: i32) -> (i32, i32) {
    %c0_i32 = arith.constant 0 : i32
    %c0_i32_0 = arith.constant 0 : i32
    %c0_i32_1 = arith.constant 0 : i32
    return %c0_i32, %c0_i32_0 : i32, i32
  }
  func.func @transform_4(%arg0: i32) -> (i32, i32) {
    %c0_i32 = arith.constant 0 : i32
    %c0_i32_0 = arith.constant 0 : i32
    %c0_i32_1 = arith.constant 0 : i32
    return %c0_i32, %c0_i32_0 : i32, i32
  }
  func.func @transform_5(%arg0: i32) -> (i32, i32) {
    %c0_i32 = arith.constant 0 : i32
    %c0_i32_0 = arith.constant 0 : i32
    %c0_i32_1 = arith.constant 0 : i32
    return %c0_i32, %c0_i32_0 : i32, i32
  }
  func.func @transform_6(%arg0: i32) -> (i32, i32, i32) {
    %c0_i32 = arith.constant 0 : i32
    %c0_i32_0 = arith.constant 0 : i32
    %c0_i32_1 = arith.constant 0 : i32
    return %arg0, %c0_i32, %c0_i32_0 : i32, i32, i32
  }
}

</mosaic_0001>

<bundles_post_ra>
// kernel: tpu_custom_call.1
= control target key start
LH: loop header
LB: loop body
LE: loop exit
PB: predicated region body
PF: predicated region fallthrough
CT: control target
= control target key end

     0   :  { %s1450_s0 = inlined_call_operand.hbm [shape: bf16[2,8,8,512], index: 0, kind: input, shape index: {}]   ;;  %s1451_s1 = inlined_call_operand.hbm [shape: f32[9,128], index: 1, kind: input, shape index: {}]   ;;  %s1452_s2 = inlined_call_operand.hbm [shape: f32[1,512], index: 2, kind: input, shape index: {}]   ;;  %s1453_s3 = inlined_call_operand.vmem [shape: f32[1,512], index: 3, kind: input, shape index: {}]   ;;  %s1454_s4 = inlined_call_operand.hbm [shape: f32[1,512], index: 4, kind: input, shape index: {}]   ;;  %s1455_s5 = inlined_call_operand.<no memory space> [shape: f32[1,1], index: 5, kind: input, shape index: {}]   ;;  %s1456_s6 = inlined_call_operand.vmem [shape: f32[2,1,1], index: 6, kind: output, shape index: {}]  }
   0x1   :  { %v11_v0 = vstv %s1455_s5 }
   0x2   :  { %12 = vst [vmem:[#allocation2] sm:$0x1] %v11_v0 }
   0x3   :  { %13 = vsyncpa [#allocation4], 0 }
   0x4   :  { %15 = vsyncpa [#allocation4 + $0x1], 0 }
   0x5   :  { %16 = vsyncpa [#allocation6], 0 }
   0x6   :  { %17 = vsyncpa [#allocation9], 0  ;;  %s1201_s23 = smov 0   ;;  %s1203_s24 = smov 0  }
   0x7   :  { %s1205_s25 = smov 0   ;;  %s1207_s26 = smov 0  }
   0x8 LB: > { %s1220_s5 = sadd.s32 4294967295, %s1154_s26   ;;  %p43_p0 = scmp.ne.s32.totalorder %s1146_s24, %s1142_s23  ;;  %s1154_s26 = sphi %s1207_s26, %s1465_s26   ;;  %s1150_s25 = sphi %s1205_s25, %s1464_s25   ;;  %s1146_s24 = sphi %s1203_s24, %s1463_s24   ;;  %s1142_s23 = sphi %s1201_s23, %s1462_s23  }
   0x9   : > { %p44_p1 = scmp.eq.s32.totalorder %s1220_s5, 0  ;;  %p873_p2 = scmp.ge.s32.totalorder %s1154_s26, 1 }
   0xa   : > { %p185_p3 = scmp.lt.s32.totalorder %s1154_s26, 3  ;;  %s196_s30 = sshll.u32 %s1451_s1, 4  ;;  %s197_s30 = int_to_ptr.hbm [resolvable:$true] %s196_s30 }
   0xb   : > { %p1228_p4 = por %p44_p1, %p43_p0  ;;  %s1156_s8 = smov [#allocation5]  }
   0xc   : > { %p1235_p5 = pnand %p873_p2, %p185_p3  ;;  %s198_s9 = sshll.u32 %s1156_s8, 4  ;;  %s199_s9 = int_to_ptr.vmem [resolvable:$true] %s198_s9 }
   0xd   : > { %s211_s13 = sshll.u32 %s1452_s2, 4  ;;  %s1157_s14 = smov 128   ;;  %s212_s13 = int_to_ptr.hbm [resolvable:$true] %s211_s13 }
   0xe   : > { %p911_p6 = pneg %p1235_p5  ;;  %s1158_s15 = smov 8  }
   0xf   : > { %s1159_s16 = smov [#allocation7]   ;;  %s226_s20 = sshll.u32 %s1454_s4, 4  ;;  %s227_s20 = int_to_ptr.hbm [resolvable:$true] %s226_s20 }
  0x10   : > { %p1243_p7 = pnand %p911_p6, %p44_p1  ;;  %s213_s17 = sshll.u32 %s1159_s16, 4  ;;  %s214_s17 = int_to_ptr.vmem [resolvable:$true] %s213_s17 }
  0x11   : > { %s1160_s21 = smov [#allocation8]   ;;  %s1258_s23 = sadd.s32 1, %s1154_s26  }
  0x12   : > { %914 = dma.hbm_to_vmem [thread:$0]  (!%p1243_p7), %s197_s30, 256, %s199_s9, [#allocation6], %s1157_s14, %s1157_s14, %s1158_s15  }
  0x13   : > { %917 = dma.hbm_to_vmem [thread:$0]  (!%p1243_p7), %s212_s13, 64, %s214_s17, [#allocation6]  }
  0x14   : > { %s228_s22 = sshll.u32 %s1160_s21, 4  ;;  %s27_s28 = ssub.s32 %s1154_s26, %s1258_s23  ;;  %s229_s22 = int_to_ptr.vmem [resolvable:$true] %s228_s22 }
  0x15   : > { %920 = dma.hbm_to_vmem [thread:$0]  (!%p1243_p7), %s227_s20, 64, %s229_s22, [#allocation9]  }
  0x16   : > { %s30_s29 = sadd.s32 1, %s1150_s25  ;;  %p28_p8 = scmp.eq.s32.totalorder %s27_s28, 0 }
  0x17   : > { %p37_p9 = scmp.ne.s32.totalorder %s1150_s25, %s1146_s24  ;;  %p38_p10 = scmp.eq.s32.totalorder %s1154_s26, 0 }
  0x18   : > { %p928_p11 = scmp.lt.s32.totalorder %s1154_s26, 2  ;;  %s242_s8 = sand.u32 1, %s1150_s25  }
  0x19   : > { %s1270_s30 = scalar_select %p28_p8, %s1150_s25, %s30_s29  }
  0x1a   : > { %p39_p12 = por %p38_p10, %p37_p9  ;;  %s878_s9 = sshll.u32 %s242_s8, 7 }
  0x1b   : > { %s896_s11 = sshll.u32 %s1154_s26, 7  ;;  %s246_s15 = scalar_lea.vmem [#allocation3], %s878_s9 }
  0x1c   : > { %s251_s14 = scalar_lea.hbm %s1450_s0, %s896_s11  ;;  %s254_s10 = sshll.u32 %s246_s15, 4  ;;  %s255_s10 = int_to_ptr.vmem [resolvable:$true] %s254_s10 }
  0x1d   : > { %s252_s16 = sshll.u32 %s251_s14, 4  ;;  %p1277_p13 = pnand %p928_p11, %p39_p12  ;;  %s253_s16 = int_to_ptr.hbm [resolvable:$true] %s252_s16 }
  0x1e   : > { %s243_s18 = scalar_lea.sflag [#allocation4], %s242_s8  ;;  %s1082_s19 = sshra.s32 %s253_s16, 4  ;;  %s1083_s19 = int_to_ptr.hbm [resolvable:$true] %s1082_s19 }
  0x1f   : > { %s1084_s20 = scalar_lea.hbm %s1083_s19, 128  ;;  %p1086_p2 = pneg %p1277_p13 }
  0x20   : > { %p1085_p0 = scmp.ne.s32.totalorder %s1083_s19, %s1084_s20  ;;  %s1089_s22 = scalar_lea.hbm %s1450_s0, 256 }
  0x21   : > { %p1090_p7 = scmp.lt.s32.totalorder %s1083_s19, %s1450_s0  ;;  %p1091_p8 = scmp.lt.s32.totalorder %s1089_s22, %s1084_s20 }
  0x22   : > { %p1087_p3 = pnand %p1086_p2, %p1085_p0 }
  0x23   : > { %p1092_p9 = por %p1091_p8, %p1090_p7 }
  0x24   : > { %p1088_p6 = pneg %p1087_p3 }
  0x26   : > { %p1093_p10 = pnand %p1092_p9, %p1088_p6 }
  0x28   : > { %1096 = shalt.err (!%p1093_p10)
}
  0x29   : > { %s1161_s8 = smov 256   ;;  %s1162_s9 = smov 16  }
  0x2a   : > { %924 = dma.hbm_to_vmem [thread:$0]  (!%p1277_p13), %s253_s16, 2048, %s255_s10, %s243_s18, %s1161_s8, %s1161_s8, %s1162_s9  }
  0x2b   : > { %266 = sbr.rel (%p1235_p5) target bundleno = 313 (0x139), region = 44  ;;  %s268_s11 = sand.u32 (!%p1235_p5), 1, %s1146_s24  }
  0x2c   : > { %s882_s12 = sshll.u32 (!%p1235_p5), %s268_s11, 7  ;;  %s269_s13 = scalar_lea.sflag (!%p1235_p5), [#allocation4], %s268_s11 }
  0x2d   : > { %s1294_s14 = scalar_lea.vmem (!%p1235_p5), [#allocation3], %s882_s12 }
  0x30   : > { %1129 = dma.done.wait (%p1228_p4), %s269_s13, 2048  }
  0x31   : > { %1131 = vsyncadd (%p1228_p4), %s269_s13, 4294965248 }
  0x32   : > { %1133 = dma.done.wait (%p44_p1), [#allocation6], 320  }
  0x33   : > { %1135 = vsyncadd (%p44_p1), [#allocation6], 4294966976 }
  0x34   : > { %1137 = dma.done.wait (%p44_p1), [#allocation9], 64  }
  0x35   : > { %1139 = vsyncadd (%p44_p1), [#allocation9], 4294967232  ;;  %v339_v1 = vlaneseq  ;;  %v1309_v3 = vld [vmem:[%s1294_s14 + $0x10] sm:$0xff]   ;;  %v1312_v4 = vld [vmem:[%s1294_s14 + $0x20] sm:$0xff]   ;;  %vm423_vm1 = vcmask 1040384   ;;  %p315_p1 = scmp.lt.s32.totalorder %s1220_s5, 1 }
  0x36   : > { %v1315_v5 = vld [vmem:[%s1294_s14 + $0x30] sm:$0xff]   ;;  %v1318_v6 = vld [vmem:[%s1294_s14 + $0x40] sm:$0xff]   ;;  %v350_v9 = vunpack.c.l.bf16 %v1309_v3  ;;  %v351_v10 = vunpack.c.l.bf16 %v1312_v4  ;;  %v436_v18 = vunpack.c.h.bf16 %v1309_v3  ;;  %v437_v25 = vunpack.c.h.bf16 %v1312_v4  ;;  %v972_v37 = vld [vmem:[%s1453_s3] ss:$0 sm:$0xff] }
  0x37   : > { %v340_v2 = vand.u32 127, %v339_v1  ;;  %v1321_v7 = vld [vmem:[%s1294_s14 + $0x50] sm:$0xff]   ;;  %v1324_v8 = vld [vmem:[%s1294_s14 + $0x60] sm:$0xff]   ;;  %v352_v11 = vunpack.c.l.bf16 %v1315_v5  ;;  %v353_v13 = vunpack.c.l.bf16 %v1318_v6  ;;  %s1467_s5 = smov (!%p315_p1, %s1220_s5), 1  ;;  %vm782_vm4 = vcmask 0  }
  0x38   : > { %v1330_v12 = vld [vmem:[%s1294_s14 + $0x70] sm:$0xff]   ;;  %v354_v14 = vunpack.c.l.bf16 %v1321_v7  ;;  %v355_v15 = vunpack.c.l.bf16 %v1324_v8  ;;  %v357_v16 = vld [vmem:[%s1294_s14] sm:$0xff]   ;;  %s317_s21 = scalar_lea.vmem %s1456_s6, %s1467_s5 }
  0x39   : > { %vm341_vm0 = vcmp.lt.s32.totalorder %v340_v2, 64  ;;  %v358_v17 = vld [vmem:[%s1294_s14 + $0x10] sm:$0xf]  ;;  %v356_v19 = vunpack.c.l.bf16 %v1330_v12  ;;  %v359_v20 = vld [vmem:[%s1294_s14 + $0x20] sm:$0xf]  ;;  %v364_v23 = vunpack.c.l.bf16 %v357_v16  ;;  %v435_v31 = vunpack.c.h.bf16 %v357_v16 }
  0x3a   : > { %v360_v21 = vld [vmem:[%s1294_s14 + $0x30] sm:$0xf]  ;;  %v361_v22 = vld [vmem:[%s1294_s14 + $0x40] sm:$0xf]  ;;  %v365_v24 = vunpack.c.l.bf16 %v358_v17  ;;  %v366_v28 = vunpack.c.l.bf16 %v359_v20  ;;  %v371_v34 = vsel %vm341_vm0, %v350_v9, 0.0  ;;  %v438_v2 = vunpack.c.h.bf16 %v1315_v5 }
  0x3b   : > { %v362_v26 = vld [vmem:[%s1294_s14 + $0x50] sm:$0xf]  ;;  %v363_v27 = vld [vmem:[%s1294_s14 + $0x60] sm:$0xf]  ;;  %v367_v29 = vunpack.c.l.bf16 %v360_v21  ;;  %v368_v30 = vunpack.c.l.bf16 %v361_v22  ;;  %v372_v35 = vsel %vm341_vm0, %v351_v10, %v364_v23 }
  0x3c   : > { %v369_v32 = vunpack.c.l.bf16 %v362_v26  ;;  %v370_v33 = vunpack.c.l.bf16 %v363_v27  ;;  %v971_v36 = vld [vmem:[#allocation7] ss:$0 sm:$0xff]  ;;  %v373_v38 = vsel %vm341_vm0, %v352_v11, %v365_v24  ;;  %v374_v39 = vsel %vm341_vm0, %v353_v13, %v366_v28  ;;  %v975_v62 = vld [vmem:[#allocation5] ss:$0 sm:$0xff]  ;;  %v973_v16 = vld [vmem:[#allocation5 + $0x1] ss:$0 sm:$0xff] }
  0x3d   : > { %v375_v40 = vsel %vm341_vm0, %v354_v14, %v367_v29  ;;  %v376_v41 = vsel %vm341_vm0, %v355_v15, %v368_v30  ;;  %v382_v44 = vmul.f32 %v971_v36, %v371_v34  ;;  %v383_v45 = vmul.f32 %v971_v36, %v372_v35  ;;  %v974_v22 = vld [vmem:[#allocation5 + $0x2] ss:$0 sm:$0xff] }
  0x3e   : > { %v377_v42 = vsel %vm341_vm0, %v356_v19, %v369_v32  ;;  %v378_v43 = vsel %vm341_vm0, 0.0, %v370_v33  ;;  %v384_v46 = vmul.f32 %v971_v36, %v373_v38  ;;  %v385_v47 = vmul.f32 %v971_v36, %v374_v39 }
  0x3f   : > { %v386_v48 = vmul.f32 %v971_v36, %v375_v40  ;;  %v387_v49 = vmul.f32 %v971_v36, %v376_v41  ;;  %v388_v50 = vmul.f32 %v971_v36, %v377_v42  ;;  %v389_v51 = vmul.f32 %v971_v36, %v378_v43 }
  0x40   : > { %v393_v52 = vadd.f32 %v972_v37, %v382_v44  ;;  %v394_v53 = vadd.f32 %v972_v37, %v383_v45  ;;  %v395_v54 = vadd.f32 %v972_v37, %v384_v46  ;;  %v396_v55 = vadd.f32 %v972_v37, %v385_v47 }
  0x41   : > { %v397_v56 = vadd.f32 %v972_v37, %v386_v48  ;;  %v398_v57 = vadd.f32 %v972_v37, %v387_v49  ;;  %v399_v58 = vadd.f32 %v972_v37, %v388_v50  ;;  %v400_v59 = vadd.f32 %v972_v37, %v389_v51  ;;  %v976_v49 = vld [vmem:[#allocation7 + $0x1] ss:$0 sm:$0xff] }
  0x42   : > { %v401_v60 = vmax.f32 %v393_v52, 0.0  ;;  %v402_v61 = vmax.f32 %v394_v53, 0.0  ;;  %v403_v63 = vmax.f32 %v395_v54, 0.0  ;;  %v404_v0 = vmax.f32 %v396_v55, 0.0 }
  0x43   : > { %v405_v1 = vmax.f32 %v397_v56, 0.0  ;;  %v406_v3 = vmax.f32 %v398_v57, 0.0  ;;  %v407_v4 = vmax.f32 %v399_v58, 0.0  ;;  %v408_v9 = vmax.f32 %v400_v59, 0.0 }
  0x44   : > { %v409_v10 = vadd.f32 %v402_v61, %v401_v60  ;;  %v439_v11 = vunpack.c.h.bf16 %v1318_v6  ;;  %v440_v13 = vunpack.c.h.bf16 %v1321_v7  ;;  %v441_v14 = vunpack.c.h.bf16 %v1324_v8 }
  0x45   : > { %v442_v15 = vunpack.c.h.bf16 %v1330_v12  ;;  %v443_v19 = vadd.f32 %v435_v31, %v371_v34  ;;  %v444_v20 = vadd.f32 %v436_v18, %v372_v35  ;;  %v445_v21 = vadd.f32 %v437_v25, %v373_v38 }
  0x46   : > { %v410_v17 = vadd.f32 %v409_v10, %v403_v63  ;;  %v446_v23 = vadd.f32 %v438_v2, %v374_v39  ;;  %v447_v5 = vadd.f32 %v439_v11, %v375_v40  ;;  %v448_v24 = vadd.f32 %v440_v13, %v376_v41  ;;  %v977_v63 = vld [vmem:[%s1453_s3 + $0x1] ss:$0 sm:$0xff] }
  0x47   : > { %v449_v26 = vadd.f32 %v441_v14, %v377_v42  ;;  %v450_v28 = vadd.f32 %v442_v15, %v378_v43  ;;  %v452_v29 = vmul.f32 %v973_v16, %v443_v19  ;;  %v457_v6 = vmul.f32 %v975_v62, %v443_v19 }
  0x48   : > { %v411_v27 = vadd.f32 %v410_v17, %v404_v0  ;;  %v463_v30 = vmul.f32 %v973_v16, %v444_v20  ;;  %v464_v7 = vmul.f32 %v973_v16, %v445_v21  ;;  %v465_v32 = vmul.f32 %v973_v16, %v446_v23 }
  0x49   : > { %v466_v8 = vmul.f32 %v973_v16, %v447_v5  ;;  %v467_v12 = vmul.f32 %v973_v16, %v448_v24  ;;  %v468_v36 = vmul.f32 %v973_v16, %v449_v26  ;;  %v475_v37 = vmul.f32 %v974_v22, %v445_v21 }
  0x4a   : > { %v412_v33 = vadd.f32 %v411_v27, %v405_v1  ;;  %v476_v31 = vmul.f32 %v974_v22, %v446_v23  ;;  %v477_v18 = vmul.f32 %v974_v22, %v447_v5  ;;  %v478_v25 = vmul.f32 %v974_v22, %v448_v24 }
  0x4b   : > { %v479_v34 = vmul.f32 %v974_v22, %v449_v26  ;;  %v480_v38 = vmul.f32 %v974_v22, %v450_v28  ;;  %v488_v39 = vmul.f32 %v973_v16, %v450_v28  ;;  %v454_v40 = vmul.f32 %v974_v22, %v444_v20 }
  0x4c   : > { %v413_v35 = vadd.f32 %v412_v33, %v406_v3  ;;  %v458_v41 = vmul.f32 %v975_v62, %v444_v20  ;;  %v459_v42 = vmul.f32 %v975_v62, %v445_v21  ;;  %v460_v43 = vmul.f32 %v975_v62, %v446_v23 }
  0x4d   : > { %v461_v44 = vmul.f32 %v975_v62, %v447_v5  ;;  %v1361_v46 = vadd.f32 %v454_v40, %v452_v29  ;;  %v462_v47 = vmul.f32 %v975_v62, %v448_v24  ;;  %v469_v48 = vadd.f32 %v463_v30, %v457_v6  ;;  %v1373_v24 = vld [vmem:[%s1294_s14 + $0x8] sm:$0xff]   ;;  %v1378_v6 = vld [vmem:[%s1294_s14 + $0x18] sm:$0xff]  }
  0x4e   : > { %v414_v45 = vadd.f32 %v413_v35, %v407_v4  ;;  %v470_v50 = vadd.f32 %v464_v7, %v458_v41  ;;  %v471_v51 = vadd.f32 %v465_v32, %v459_v42  ;;  %v472_v52 = vadd.f32 %v466_v8, %v460_v43  ;;  %v1381_v30 = vld [vmem:[%s1294_s14 + $0x28] sm:$0xff]   ;;  %v1384_v7 = vld [vmem:[%s1294_s14 + $0x38] sm:$0xff]   ;;  %v326_v43 = vld [vmem:[#allocation8] sm:$0x1] }
  0x4f   : > { %v473_v53 = vadd.f32 %v467_v12, %v461_v44  ;;  %v474_v55 = vadd.f32 %v468_v36, %v462_v47  ;;  %v481_v56 = vadd.f32 %v475_v37, %v469_v48  ;;  %v487_v57 = vmul.f32 %v975_v62, %v449_v26  ;;  %v1387_v36 = vld [vmem:[%s1294_s14 + $0x48] sm:$0xff]   ;;  %v1390_v37 = vld [vmem:[%s1294_s14 + $0x58] sm:$0xff]  }
  0x50   : > { %v415_v54 = vadd.f32 %v414_v45, %v408_v9  ;;  %v482_v58 = vadd.f32 %v476_v31, %v470_v50  ;;  %v483_v59 = vadd.f32 %v477_v18, %v471_v51  ;;  %v484_v60 = vadd.f32 %v478_v25, %v472_v52  ;;  %v1393_v31 = vld [vmem:[%s1294_s14 + $0x68] sm:$0xff]   ;;  %v1398_v35 = vld [vmem:[%s1294_s14 + $0x78] sm:$0xff]   ;;  %v980_v50 = vld [vmem:[#allocation5 + $0x3] ss:$0 sm:$0xff] }
  0x51   : > { %v1363_v61 = vadd.f32 %v479_v34, %v473_v53  ;;  %v486_v1 = vadd.f32 %v480_v38, %v474_v55  ;;  %v489_v2 = vadd.f32 %v488_v39, %v487_v57  ;;  %v493_v3 = vmul.f32 %v976_v49, %v1361_v46 }
  0x52   : > { %v416_v0 = vrot.slane %v415_v54, 4  ;;  %v494_v4 = vmul.f32 %v976_v49, %v481_v56  ;;  %v495_v10 = vmul.f32 %v976_v49, %v482_v58  ;;  %v496_v9 = vmul.f32 %v976_v49, %v483_v59 }
  0x53   : > { %v497_v11 = vmul.f32 %v976_v49, %v484_v60  ;;  %v498_v13 = vmul.f32 %v976_v49, %v1363_v61  ;;  %v499_v14 = vmul.f32 %v976_v49, %v486_v1  ;;  %v500_v15 = vmul.f32 %v976_v49, %v489_v2  ;;  %v979_v49 = vld [vmem:[#allocation5 + $0x5] ss:$0 sm:$0xff] }
  0x54   : > { %v417_v62 = vadd.f32 %v416_v0, %v415_v54  ;;  %v504_v16 = vadd.f32 %v977_v63, %v493_v3  ;;  %v505_v17 = vadd.f32 %v977_v63, %v494_v4  ;;  %v506_v19 = vadd.f32 %v977_v63, %v495_v10  ;;  %v978_v3 = vld [vmem:[#allocation5 + $0x4] ss:$0 sm:$0xff] }
  0x55   : > { %v507_v20 = vadd.f32 %v977_v63, %v496_v9  ;;  %v508_v22 = vadd.f32 %v977_v63, %v497_v11  ;;  %v509_v23 = vadd.f32 %v977_v63, %v498_v13  ;;  %v1370_v5 = vadd.f32 %v977_v63, %v499_v14 }
  0x56   : > { %v418_v21 = vrot.slane %v417_v62, 2  ;;  %v1375_v26 = vadd.f32 %v977_v63, %v500_v15  ;;  %v512_v27 = vmax.f32 %v504_v16, 0.0  ;;  %v513_v28 = vmax.f32 %v505_v17, 0.0 }
  0x57   : > { %v514_v29 = vmax.f32 %v506_v19, 0.0  ;;  %v515_v8 = vmax.f32 %v507_v20, 0.0  ;;  %v516_v33 = vmax.f32 %v508_v22, 0.0  ;;  %v517_v12 = vmax.f32 %v509_v23, 0.0 }
  0x58   : > { %v419_v32 = vadd.f32 %v418_v21, %v417_v62  ;;  %v518_v18 = vmax.f32 %v1370_v5, 0.0  ;;  %v519_v25 = vmax.f32 %v1375_v26, 0.0  ;;  %v520_v34 = vadd.f32 %v513_v28, %v512_v27 }
  0x59   : > { %v546_v38 = vunpack.c.l.bf16 %v1373_v24  ;;  %v547_v40 = vunpack.c.l.bf16 %v1378_v6  ;;  %v548_v41 = vunpack.c.l.bf16 %v1381_v30  ;;  %v549_v42 = vunpack.c.l.bf16 %v1384_v7 }
  0x5a   : > { %v420_v39 = vrot.slane %v419_v32, 1  ;;  %v521_v44 = vadd.f32 %v520_v34, %v514_v29  ;;  %v550_v45 = vunpack.c.l.bf16 %v1387_v36  ;;  %v551_v47 = vunpack.c.l.bf16 %v1390_v37  ;;  %v981_v34 = vld [vmem:[#allocation7 + $0x2] ss:$0 sm:$0xff] }
  0x5b   : > { %v552_v48 = vunpack.c.l.bf16 %v1393_v31  ;;  %v553_v52 = vunpack.c.l.bf16 %v1398_v35  ;;  %v554_v53 = vadd.f32 %v546_v38, %v1361_v46  ;;  %v555_v54 = vadd.f32 %v547_v40, %v481_v56 }
  0x5c   : > { %v421_v51 = vadd.f32 %v420_v39, %v419_v32  ;;  %v522_v55 = vadd.f32 %v521_v44, %v515_v8  ;;  %v556_v57 = vadd.f32 %v548_v41, %v482_v58  ;;  %v557_v63 = vadd.f32 %v549_v42, %v483_v59 }
  0x5d   : > { %v558_v0 = vadd.f32 %v550_v45, %v484_v60  ;;  %v559_v10 = vadd.f32 %v551_v47, %v1363_v61  ;;  %v560_v9 = vadd.f32 %v552_v48, %v486_v1  ;;  %v561_v11 = vadd.f32 %v553_v52, %v489_v2  ;;  %v982_v45 = vld [vmem:[%s1453_s3 + $0x2] ss:$0 sm:$0xff] }
  0x5e   : > { %v422_v4 = vmul.f32 %v421_v51, %v326_v43  ;;  %v523_v62 = vadd.f32 %v522_v55, %v516_v33  ;;  %v563_v13 = vmul.f32 %v978_v3, %v554_v53  ;;  %v565_v14 = vmul.f32 %v979_v49, %v555_v54 }
  0x5f   : > { %v568_v15 = vmul.f32 %v980_v50, %v554_v53  ;;  %v569_v17 = vmul.f32 %v980_v50, %v555_v54  ;;  %v570_v19 = vmul.f32 %v980_v50, %v556_v57  ;;  %v571_v46 = vmul.f32 %v980_v50, %v557_v63 }
  0x60   : > { %v424_v16 = vsel %vm423_vm1, %v422_v4, 0.0  ;;  %v524_v56 = vadd.f32 %v523_v62, %v517_v12  ;;  %v1411_v58 = vadd.f32 %v565_v14, %v563_v13  ;;  %v572_v59 = vmul.f32 %v980_v50, %v558_v0 }
  0x61   : > { %425 = vadd.xlane.f32.xlu0 %v424_v16  ;;  %v573_v60 = vmul.f32 %v980_v50, %v559_v10  ;;  %v574_v20 = vmul.f32 %v978_v3, %v555_v54  ;;  %v575_v21 = vmul.f32 %v978_v3, %v556_v57  ;;  %v576_v61 = vmul.f32 %v978_v3, %v557_v63 }
  0x62   : > { %v577_v1 = vmul.f32 %v978_v3, %v558_v0  ;;  %v525_v2 = vadd.f32 %v524_v56, %v518_v18  ;;  %v578_v22 = vmul.f32 %v978_v3, %v559_v10  ;;  %v579_v23 = vmul.f32 %v978_v3, %v560_v9 }
  0x63   : > { %v586_v5 = vmul.f32 %v979_v49, %v556_v57  ;;  %v580_v26 = vadd.f32 %v574_v20, %v568_v15  ;;  %v581_v27 = vadd.f32 %v575_v21, %v569_v17  ;;  %v582_v28 = vadd.f32 %v576_v61, %v570_v19 }
  0x64   : > { %v583_v29 = vadd.f32 %v577_v1, %v571_v46  ;;  %v526_v32 = vadd.f32 %v525_v2, %v519_v25  ;;  %v584_v8 = vadd.f32 %v578_v22, %v572_v59  ;;  %v585_v33 = vadd.f32 %v579_v23, %v573_v60  ;;  %v327_v1 = vld [vmem:[#allocation8 + $0x1] sm:$0x1] }
  0x65   : > { %v587_v12 = vmul.f32 %v979_v49, %v557_v63  ;;  %v588_v38 = vmul.f32 %v979_v49, %v558_v0  ;;  %v589_v39 = vmul.f32 %v979_v49, %v559_v10  ;;  %v590_v40 = vmul.f32 %v979_v49, %v560_v9 }
  0x66   : > { %v591_v41 = vmul.f32 %v979_v49, %v561_v11  ;;  %v527_v42 = vrot.slane %v526_v32, 4  ;;  %v592_v43 = vadd.f32 %v586_v5, %v580_v26  ;;  %v598_v18 = vmul.f32 %v980_v50, %v560_v9 }
  0x67   : > { %v593_v44 = vadd.f32 %v587_v12, %v581_v27  ;;  %v594_v47 = vadd.f32 %v588_v38, %v582_v28  ;;  %v595_v48 = vadd.f32 %v589_v39, %v583_v29  ;;  %v596_v51 = vadd.f32 %v590_v40, %v584_v8  ;;  %v984_v38 = vld [vmem:[#allocation5 + $0x6] ss:$0 sm:$0xff] }
  0x68   : > { %v597_v25 = vadd.f32 %v591_v41, %v585_v33  ;;  %v528_v52 = vadd.f32 %v527_v42, %v526_v32  ;;  %v599_v53 = vmul.f32 %v978_v3, %v561_v11  ;;  %v604_v54 = vmul.f32 %v981_v34, %v1411_v58 }
  0x69   : > { %v605_v55 = vmul.f32 %v981_v34, %v592_v43  ;;  %v606_v57 = vmul.f32 %v981_v34, %v593_v44  ;;  %v607_v63 = vmul.f32 %v981_v34, %v594_v47  ;;  %v608_v49 = vmul.f32 %v981_v34, %v595_v48 }
  0x6a   : > { %v609_v0 = vmul.f32 %v981_v34, %v596_v51  ;;  %v529_v4 = vrot.slane %v528_v52, 2  ;;  %v600_v10 = vadd.f32 %v599_v53, %v598_v18  ;;  %v610_v50 = vmul.f32 %v981_v34, %v597_v25 }
  0x6b   : > { %v615_v9 = vadd.f32 %v982_v45, %v604_v54  ;;  %v616_v62 = vadd.f32 %v982_v45, %v605_v55  ;;  %v617_v13 = vadd.f32 %v982_v45, %v606_v57  ;;  %v618_v14 = vadd.f32 %v982_v45, %v607_v63 }
  0x6c   : > { %v619_v15 = vadd.f32 %v982_v45, %v608_v49  ;;  %v530_v16 = vadd.f32 %v529_v4, %v528_v52  ;;  %v611_v17 = vmul.f32 %v981_v34, %v600_v10  ;;  %v620_v19 = vadd.f32 %v982_v45, %v609_v0  ;;  %v983_v34 = vld [vmem:[#allocation5 + $0x8] ss:$0 sm:$0xff] }
  0x6d   : > { %v621_v46 = vadd.f32 %v982_v45, %v610_v50  ;;  %v623_v3 = vmax.f32 %v615_v9, 0.0  ;;  %v624_v11 = vmax.f32 %v616_v62, 0.0  ;;  %v625_v56 = vmax.f32 %v617_v13, 0.0 }
  0x6e   : > { %v626_v59 = vmax.f32 %v618_v14, 0.0  ;;  %v531_v60 = vrot.slane %v530_v16, 1  ;;  %v622_v20 = vadd.f32 %v982_v45, %v611_v17  ;;  %v627_v21 = vmax.f32 %v619_v15, 0.0 }
  0x6f   : > { %v628_v61 = vmax.f32 %v620_v19, 0.0  ;;  %v629_v2 = vmax.f32 %v621_v46, 0.0  ;;  %v631_v22 = vadd.f32 %v624_v11, %v623_v3  ;;  %v657_v23 = vunpack.c.h.bf16 %v1373_v24  ;;  %v986_v3 = vld [vmem:[#allocation7 + $0x3] ss:$0 sm:$0xff] }
  0x70   : > { %v658_v5 = vunpack.c.h.bf16 %v1378_v6  ;;  %v532_v26 = vadd.f32 %v531_v60, %v530_v16  ;;  %v630_v27 = vmax.f32 %v622_v20, 0.0  ;;  %v659_v28 = vunpack.c.h.bf16 %v1381_v30 }
  0x71   : > { %v660_v29 = vunpack.c.h.bf16 %v1384_v7  ;;  %v632_v32 = vadd.f32 %v631_v22, %v625_v56  ;;  %v661_v8 = vunpack.c.h.bf16 %v1387_v36  ;;  %v662_v33 = vunpack.c.h.bf16 %v1390_v37  ;;  %v985_v7 = vld [vmem:[#allocation5 + $0x7] ss:$0 sm:$0xff] }
  0x72   : > { %v663_v12 = vunpack.c.h.bf16 %v1393_v31  ;;  %v533_v39 = vmul.f32 %v532_v26, %v327_v1  ;;  %v664_v24 = vunpack.c.h.bf16 %v1398_v35  ;;  %v665_v6 = vadd.f32 %v657_v23, %v1411_v58  ;;  %v987_v1 = vld [vmem:[%s1453_s3 + $0x3] ss:$0 sm:$0xff] }
  0x73   : > { %v666_v40 = vadd.f32 %v658_v5, %v592_v43  ;;  %v633_v41 = vadd.f32 %v632_v32, %v626_v59  ;;  %v667_v42 = vadd.f32 %v659_v28, %v593_v44  ;;  %v668_v30 = vadd.f32 %v660_v29, %v594_v47 }
  0x74   : > { %v669_v18 = vadd.f32 %v661_v8, %v595_v48  ;;  %v534_v45 = vsel %vm423_vm1, %v533_v39, 0.0  ;;  %v670_v36 = vadd.f32 %v662_v33, %v596_v51  ;;  %v671_v52 = vadd.f32 %v663_v12, %v597_v25 }
  0x75   : > { %v672_v37 = vadd.f32 %v664_v24, %v600_v10  ;;  %535 = vadd.xlane.f32.xlu0 %v534_v45  ;;  %v634_v31 = vadd.f32 %v633_v41, %v627_v21  ;;  %v679_v53 = vmul.f32 %v984_v38, %v665_v6  ;;  %v674_v54 = vmul.f32 %v985_v7, %v665_v6 }
  0x76   : > { %v676_v55 = vmul.f32 %v983_v34, %v666_v40  ;;  %v680_v35 = vmul.f32 %v984_v38, %v666_v40  ;;  %v681_v63 = vmul.f32 %v984_v38, %v667_v42  ;;  %v682_v58 = vmul.f32 %v984_v38, %v668_v30 }
  0x77   : > { %v702_v57 = vmul.f32 %v983_v34, %v672_v37  ;;  %v635_v43 = vadd.f32 %v634_v31, %v628_v61  ;;  %v683_v44 = vmul.f32 %v984_v38, %v669_v18  ;;  %v684_v47 = vmul.f32 %v984_v38, %v670_v36 }
  0x78   : > { %v677_v49 = vadd.f32 %v676_v55, %v674_v54  ;;  %v685_v48 = vmul.f32 %v985_v7, %v666_v40  ;;  %v686_v0 = vmul.f32 %v985_v7, %v667_v42  ;;  %v687_v4 = vmul.f32 %v985_v7, %v668_v30 }
  0x79   : > { %v688_v50 = vmul.f32 %v985_v7, %v669_v18  ;;  %v636_v51 = vadd.f32 %v635_v43, %v629_v2  ;;  %v689_v25 = vmul.f32 %v985_v7, %v670_v36  ;;  %v690_v10 = vmul.f32 %v985_v7, %v671_v52 }
  0x7a   : > { %v697_v9 = vmul.f32 %v983_v34, %v667_v42  ;;  %v691_v62 = vadd.f32 %v685_v48, %v679_v53  ;;  %v692_v13 = vadd.f32 %v686_v0, %v680_v35  ;;  %v693_v14 = vadd.f32 %v687_v4, %v681_v63 }
  0x7b   : > { %v694_v15 = vadd.f32 %v688_v50, %v682_v58  ;;  %v637_v16 = vadd.f32 %v636_v51, %v630_v27  ;;  %v695_v17 = vadd.f32 %v689_v25, %v683_v44  ;;  %v696_v19 = vadd.f32 %v690_v10, %v684_v47 }
  0x7c   : > { %v698_v46 = vmul.f32 %v983_v34, %v668_v30  ;;  %v699_v11 = vmul.f32 %v983_v34, %v669_v18  ;;  %v700_v56 = vmul.f32 %v983_v34, %v670_v36  ;;  %v701_v59 = vmul.f32 %v983_v34, %v671_v52 }
  0x7d   : > { %v703_v60 = vadd.f32 %v697_v9, %v691_v62  ;;  %v638_v20 = vrot.slane %v637_v16, 4  ;;  %v709_v61 = vmul.f32 %v984_v38, %v671_v52  ;;  %v710_v5 = vmul.f32 %v985_v7, %v672_v37  ;;  %v328_v52 = vld [vmem:[#allocation8 + $0x2] sm:$0x1] }
  0x7e   : > { %v704_v21 = vadd.f32 %v698_v46, %v692_v13  ;;  %v705_v2 = vadd.f32 %v699_v11, %v693_v14  ;;  %v706_v22 = vadd.f32 %v700_v56, %v694_v15  ;;  %v707_v23 = vadd.f32 %v701_v59, %v695_v17  ;;  %v329_v15 = vld [vmem:[#allocation8 + $0x3] sm:$0x1] }
  0x7f   : > { %v639_v26 = vadd.f32 %v638_v20, %v637_v16  ;;  %v715_v27 = vmul.f32 %v986_v3, %v677_v49  ;;  %v716_v28 = vmul.f32 %v986_v3, %v703_v60  ;;  %v708_v32 = vadd.f32 %v702_v57, %v696_v19 }
  0x80   : > { %v717_v29 = vmul.f32 %v986_v3, %v704_v21  ;;  %v718_v8 = vmul.f32 %v986_v3, %v705_v2  ;;  %v719_v33 = vmul.f32 %v986_v3, %v706_v22  ;;  %v711_v24 = vadd.f32 %v710_v5, %v709_v61  ;;  %v761_v21 = vld [vmem:[#allocation2] sm:$0x1] }
  0x81   : > { %v640_v12 = vrot.slane %v639_v26, 2  ;;  %v726_v34 = vadd.f32 %v987_v1, %v715_v27  ;;  %v727_v39 = vadd.f32 %v987_v1, %v716_v28  ;;  %v720_v38 = vmul.f32 %v986_v3, %v707_v23 }
  0x82   : > { %v728_v6 = vadd.f32 %v987_v1, %v717_v29  ;;  %v729_v40 = vadd.f32 %v987_v1, %v718_v8  ;;  %v721_v30 = vmul.f32 %v986_v3, %v708_v32  ;;  %v730_v18 = vadd.f32 %v987_v1, %v719_v33 }
  0x83   : > { %v641_v41 = vadd.f32 %v640_v12, %v639_v26  ;;  %v734_v42 = vmax.f32 %v726_v34, 0.0  ;;  %v735_v45 = vmax.f32 %v727_v39, 0.0  ;;  %v722_v37 = vmul.f32 %v986_v3, %v711_v24 }
  0x84   : > { %v736_v7 = vmax.f32 %v728_v6, 0.0  ;;  %v731_v31 = vadd.f32 %v987_v1, %v720_v38  ;;  %v737_v53 = vmax.f32 %v729_v40, 0.0  ;;  %v732_v57 = vadd.f32 %v987_v1, %v721_v30 }
  0x85   : > { %v642_v36 = vrot.slane %v641_v41, 1  ;;  %v742_v54 = vadd.f32 %v735_v45, %v734_v42  ;;  %v738_v35 = vmax.f32 %v730_v18, 0.0  ;;  %v733_v43 = vadd.f32 %v987_v1, %v722_v37 }
  0x86   : > { %v739_v49 = vmax.f32 %v731_v31, 0.0  ;;  %v740_v48 = vmax.f32 %v732_v57, 0.0 }
  0x87   : > { %v643_v55 = vadd.f32 %v642_v36, %v641_v41  ;;  %v743_v63 = vadd.f32 %v742_v54, %v736_v7  ;;  %v741_v4 = vmax.f32 %v733_v43, 0.0 }
  0x89   : > { %v644_v58 = vmul.f32 %v643_v55, %v328_v52  ;;  %v744_v44 = vadd.f32 %v743_v63, %v737_v53 }
  0x8b   : > { %v645_v47 = vsel %vm423_vm1, %v644_v58, 0.0  ;;  %v745_v0 = vadd.f32 %v744_v44, %v738_v35 }
  0x8c   : > { %646 = vadd.xlane.f32.xlu1 %v645_v47 }
  0x8d   : > { %v746_v50 = vadd.f32 %v745_v0, %v739_v49 }
  0x8f   : > { %v747_v51 = vadd.f32 %v746_v50, %v740_v48 }
  0x91   : > { %v748_v25 = vadd.f32 %v747_v51, %v741_v4 }
  0x93   : > { %v749_v10 = vrot.slane %v748_v25, 4 }
  0x95   : > { %v750_v9 = vadd.f32 %v749_v10, %v748_v25 }
  0x97   : > { %v751_v62 = vrot.slane %v750_v9, 2 }
  0x99   : > { %v752_v13 = vadd.f32 %v751_v62, %v750_v9 }
  0x9b   : > { %v753_v14 = vrot.slane %v752_v13, 1 }
  0x9d   : > { %v754_v16 = vadd.f32 %v753_v14, %v752_v13 }
  0x9f   : > { %v755_v17 = vmul.f32 %v754_v16, %v329_v15 }
  0xa1   : > { %v756_v19 = vsel %vm423_vm1, %v755_v17, 0.0 }
  0xa2   : > { %757 = vadd.xlane.f32.xlu1 %v756_v19 }
  0xd4   : > { %v426_v46 = vpop.xlane.xlu0 %425 }
  0xe8   : > { %v536_v11 = vpop.xlane.xlu0 %535 }
  0xe9   : > { %v537_v56 = vadd.f32 %v536_v11, %v426_v46 }
  0xff   : > { %v647_v3 = vpop.xlane.xlu1 %646 }
 0x100   : > { %v648_v59 = vadd.f32 %v647_v3, %v537_v56 }
 0x115   : > { %v758_v60 = vpop.xlane.xlu1 %757 }
 0x116   : > { %v759_v20 = vadd.f32 %v758_v60, %v648_v59 }
 0x118   : > { %v760_v61 = vmul.f32 0.015625, %v759_v20 }
 0x11a   : > { %v762_v1 = vadd.f32 %v761_v21, %v760_v61 }
 0x11c   : > { %v893_v2 = vmul.f32 -1.442695, %v762_v1 }
 0x11e   : > { %988 = vpow2.f32 %v893_v2 }
 0x124   : > { %v989_v22 = vpop.eup %988 }
 0x125   : > { %v766_v23 = vadd.f32 1.0, %v989_v22 }
 0x127   : > { %990 = vrcp.f32 %v766_v23  ;;  %v778_v28 = vand.u32 2147483648, %v766_v23  ;;  %v776_v32 = vand.u32 2147483647, %v766_v23  ;;  %vm772_vm3 = vweird.f32 %v766_v23 }
 0x129   : > { %v779_v33 = vor.u32 1.1754944e-38, %v778_v28  ;;  %vm777_vm6 = vcmp.eq.f32.partialorder %v776_v32, 8.507059e+37 }
 0x12d   : > { %v991_v5 = vpop.eup %990 }
 0x12e   : > { %v768_v26 = vmul.f32 %v991_v5, %v766_v23  ;;  %vm773_vm2 = vweird.f32 %v991_v5 }
 0x12f   : > { %vm774_vm5 = vmor %vm772_vm3, %vm773_vm2 }
 0x130   : > { %v769_v27 = vsub.f32 1.0, %v768_v26 }
 0x132   : > { %v770_v29 = vmul.f32 %v991_v5, %v769_v27 }
 0x134   : > { %v771_v8 = vadd.f32 %v991_v5, %v770_v29 }
 0x136   : > { %v775_v12 = vsel %vm774_vm5, %v991_v5, %v771_v8 }
 0x137   : > { %v780_v34 = vsel %vm777_vm6, %v779_v33, %v775_v12 }
 0x138   : > { %783 = vst.msk [vmem:[%s317_s21] sm:$0x1] %vm782_vm4, %v780_v34 }
 0x139 PF: > { %s1461_s22 = smov %s1258_s23  ;;  %p20_p4 = scmp.ge.s32.totalorder %s1258_s23, 4  }
 0x13a   : > { %s1462_s23 = smov %s1146_s24  ;;  %s1463_s24 = smov %s1150_s25 }
 0x13b   : > { %s1464_s25 = smov %s1270_s30  ;;  %s1465_s26 = smov %s1461_s22 }
 0x13c   :  { %22 = sbr.rel (!%p20_p4) target bundleno = 8 (0x8), region = 97 }
 0x141   :  { %801 = vsyncpa [#allocation4], 1 }
 0x142   :  { %803 = vsyncpa [#allocation4 + $0x1], 1 }
 0x143   :  { %804 = vsyncpa [#allocation6], 1 }
 0x144   :  { %805 = vsyncpa [#allocation9], 1 }

</bundles_post_ra>
